<compile_context>
chip_gen: v6e
topology: v6e:2x2x1
jax: 0.10.0
libtpu: 0.0.40
codegen_flags: <defaults>
</compile_context>

<pallas_src>
import functools

import jax
import jax.numpy as jnp
from jax.experimental import pallas as pl
from jax.experimental.pallas import tpu as pltpu


# ----------------------------------------------------------------------------
# Fused kernel: q-encoder + k-encoder + contrastive head.
# Grid = (batch blocks ["parallel"], queue blocks ["arbitrary"]).
# ----------------------------------------------------------------------------
def _encode(x_ref, wb_ref, bb_ref, w1_ref, b1_ref, w2_ref, b2_ref, inv_hw):
    """pool -> linear -> linear+relu -> linear -> F.normalize(dim=-1)."""
    # x_ref: (NB, C_pad, HW) f32.  Global average pool over the spatial axis.
    pooled = jnp.sum(x_ref[...], axis=2) * inv_hw                  # (NB, Cp) f32
    # bf16 into the MXU, f32 accumulation, f32 bias adds (feedback #2).
    h0 = jnp.dot(pooled.astype(jnp.bfloat16), wb_ref[...],
                 preferred_element_type=jnp.float32) + bb_ref[...]
    h1 = jnp.dot(h0.astype(jnp.bfloat16), w1_ref[...],
                 preferred_element_type=jnp.float32) + b1_ref[...]
    h1 = jnp.maximum(h1, 0.0)                                      # ReLU
    feat = jnp.dot(h1.astype(jnp.bfloat16), w2_ref[...],
                   preferred_element_type=jnp.float32) + b2_ref[...]
    # F.normalize: x / max(||x||, 1e-12) == x * rsqrt(max(||x||^2, 1e-24)).
    # rsqrt goes to the EUP (own VLIW slot) instead of a VALU divide (#9).
    nsq = jnp.sum(feat * feat, axis=1, keepdims=True)
    return feat * jax.lax.rsqrt(jnp.maximum(nsq, 1e-24))


def _fused_kernel(xq_ref, xk_ref,
                  wbq_ref, bbq_ref, w1q_ref, b1q_ref, w2q_ref, b2q_ref,
                  wbk_ref, bbk_ref, w1k_ref, b1k_ref, w2k_ref, b2k_ref,
                  queue_ref,
                  stats_ref, kout_ref,
                  qfeat_sc, lpos_sc, m_sc, s_sc,
                  *, inv_hw, inv_temp):
    j = pl.program_id(1)

    # --- once per batch block: run both encoders, keep features in VMEM (#1).
    @pl.when(j == 0)
    def _init():
        q = _encode(xq_ref, wbq_ref, bbq_ref, w1q_ref, b1q_ref, w2q_ref,
                    b2q_ref, inv_hw)
        k = _encode(xk_ref, wbk_ref, bbk_ref, w1k_ref, b1k_ref, w2k_ref,
                    b2k_ref, inv_hw)
        q_scaled = q * inv_temp            # fold 1/T into q once (not per block)
        qfeat_sc[...] = q_scaled
        kout_ref[...] = k.astype(kout_ref.dtype)
        # positive logit (diag of q @ k^T in the single-device setting), / T.
        lpos_sc[...] = jnp.sum(q_scaled * k, axis=1, keepdims=True)
        m_sc[...] = jnp.full(m_sc.shape, -jnp.inf, jnp.float32)
        s_sc[...] = jnp.zeros(s_sc.shape, jnp.float32)

    # --- every step: one (K_block, dim) slab of negatives, online LSE (#5).
    q_bf = qfeat_sc[...].astype(jnp.bfloat16)
    # 'nc,kc->nk': queue stored (K, dim); transposed-RHS contraction is
    # MXU-native, no transpose of the queue needed (#3).
    z = jax.lax.dot_general(q_bf, queue_ref[...],
                            dimension_numbers=(((1,), (1,)), ((), ())),
                            preferred_element_type=jnp.float32)
    bmax = jnp.max(z, axis=1, keepdims=True)
    m_new = jnp.maximum(m_sc[...], bmax)
    s_sc[...] = (s_sc[...] * jnp.exp(m_sc[...] - m_new)
                 + jnp.sum(jnp.exp(z - m_new), axis=1, keepdims=True))
    m_sc[...] = m_new

    # --- last queue block: per-row CE loss (label 0) + top-1 correctness.
    @pl.when(j == pl.num_programs(1) - 1)
    def _finalize():
        lpos = lpos_sc[...]
        m_neg = m_sc[...]                              # max over ALL negatives
        mt = jnp.maximum(m_neg, lpos)
        total = s_sc[...] * jnp.exp(m_neg - mt) + jnp.exp(lpos - mt)
        lse = jnp.log(total) + mt
        # pack loss + correctness into one small per-block output (#10).
        stats_ref[:, 0:1] = lse - lpos                        # cross entropy
        stats_ref[:, 1:2] = (lpos >= m_neg).astype(jnp.float32)  # top-1 hit


def fused_forward(im_q, im_k, params_q, params_k, queue, temp,
                  *, batch_block=8, k_block=256):
    """Both encoders + contrastive head in ONE pallas_call.

    Returns (stats, k_feat): stats[:, 0] per-row CE loss, stats[:, 1] per-row
    top-1 correctness; k_feat the normalized key features (f32).
    """
    n, c, h, w = im_q.shape
    hw = h * w
    kq, dim = queue.shape
    dm = params_q[0].shape[1]
    assert params_q[4].shape[1] == dim
    assert n % batch_block == 0 and kq % k_block == 0

    # Pad the channel axis up to a sublane multiple of 8 (#8): zero channels
    # contribute 0 to the pool and meet zero rows in wb -> identical result.
    c_pad = max(8, -(-c // 8) * 8)

    def prep_images(x):
        x3 = x.reshape(n, c, hw)
        if c_pad != c:
            x3 = jnp.concatenate(
                [x3, jnp.zeros((n, c_pad - c, hw), x3.dtype)], axis=1)
        return x3

    def prep_params(params):
        wb, bb, w1, b1, w2, b2 = params
        if c_pad != c:
            wb = jnp.concatenate(
                [wb, jnp.zeros((c_pad - c, dm), wb.dtype)], axis=0)
        # Weights go to the MXU in bf16; biases stay f32 (#2).
        return (wb.astype(jnp.bfloat16), bb,
                w1.astype(jnp.bfloat16), b1,
                w2.astype(jnp.bfloat16), b2)

    xq = prep_images(im_q)
    xk = prep_images(im_k)
    pq = prep_params(params_q)
    pk = prep_params(params_k)

    num_n = n // batch_block
    num_k = kq // k_block

    # Images: streamed per batch block (index independent of the K axis, so
    # they are DMA'd once per batch block, not per queue block) (#6).
    img_spec = pl.BlockSpec((batch_block, c_pad, hw), lambda i, j: (i, 0, 0))

    def const_spec(shape):                      # resident weights, DMA'd once
        return pl.BlockSpec(shape, lambda i, j, _s=shape: (0,) * len(_s))

    param_specs = ([const_spec(p.shape) for p in pq]
                   + [const_spec(p.shape) for p in pk])

    # Queue: (K, dim) tiled along K, streamed as the reduction axis (#3, #5).
    queue_spec = pl.BlockSpec((k_block, dim), lambda i, j: (j, 0))

    kern = functools.partial(_fused_kernel, inv_hw=1.0 / hw,
                             inv_temp=1.0 / temp)

    stats, k_feat = pl.pallas_call(
        kern,
        grid=(num_n, num_k),
        in_specs=[img_spec, img_spec] + param_specs + [queue_spec],
        out_specs=(pl.BlockSpec((batch_block, 2), lambda i, j: (i, 0)),
                   pl.BlockSpec((batch_block, dim), lambda i, j: (i, 0))),
        out_shape=(jax.ShapeDtypeStruct((n, 2), jnp.float32),
                   jax.ShapeDtypeStruct((n, dim), jnp.float32)),
        scratch_shapes=[pltpu.VMEM((batch_block, dim), jnp.float32),  # q / T
                        pltpu.VMEM((batch_block, 1), jnp.float32),    # l_pos
                        pltpu.VMEM((batch_block, 1), jnp.float32),    # running max
                        pltpu.VMEM((batch_block, 1), jnp.float32)],   # running sum
        compiler_params=pltpu.CompilerParams(
            # batch axis shards across TensorCores on megacore parts (#7);
            # queue axis is a sequential reduction.
            dimension_semantics=("parallel", "arbitrary"),
            vmem_limit_bytes=32 * 1024 * 1024),
    )(xq, xk, *pq, *pk, queue)
    return stats, k_feat


# ----------------------------------------------------------------------------
# In-place queue update: queue[ptr:ptr+N, :] = keys  (queue stored (K, dim),
# so this is a single contiguous lane-dense row-block write), aliased so the
# queue buffer is updated in place instead of copied (#3, #4).
# ----------------------------------------------------------------------------
def _enqueue_kernel(ptr_ref, keys_ref, queue_in_ref, queue_out_ref, sem):
    del queue_in_ref                      # aliased with queue_out_ref
    nkeys = keys_ref.shape[0]
    ptr = pl.multiple_of(ptr_ref[0], nkeys)   # K % N == 0 -> ptr aligned
    cp = pltpu.make_async_copy(
        keys_ref, queue_out_ref.at[pl.ds(ptr, nkeys), :], sem)
    cp.start()
    cp.wait()


def dequeue_and_enqueue(queue, keys, queue_ptr):
    kq, _ = queue.shape
    n = keys.shape[0]
    new_queue = pl.pallas_call(
        _enqueue_kernel,
        out_shape=jax.ShapeDtypeStruct(queue.shape, queue.dtype),
        in_specs=[pl.BlockSpec(memory_space=pltpu.MemorySpace.SMEM),  # ptr
                  pl.BlockSpec(memory_space=pltpu.MemorySpace.VMEM),  # keys
                  pl.BlockSpec(memory_space=pl.ANY)],                 # queue (HBM)
        out_specs=pl.BlockSpec(memory_space=pl.ANY),
        scratch_shapes=[pltpu.SemaphoreType.DMA],
        input_output_aliases={2: 0},      # queue updated in place: O(N*dim)
    )(queue_ptr, keys.astype(queue.dtype), queue)
    new_ptr = (queue_ptr + n) % kq
    return new_queue, new_ptr


# ----------------------------------------------------------------------------
# Module glue (momentum update kept on f32 master weights).
# ----------------------------------------------------------------------------
def momentum_update(params_q, params_k, m):
    return tuple(pk * m + pq * (1.0 - m) for pq, pk in zip(params_q, params_k))


def mosrep_forward(im_q, im_k, params_q, params_k, queue, queue_ptr,
                   m=0.999, temp=0.2):
    # key-encoder momentum update (no_grad branch in the reference).
    params_k = momentum_update(params_q, params_k, m)

    # Single device (world_size == 1): concat_all_gather is the identity and
    # the DDP batch shuffle/unshuffle is an exact inverse pair for this
    # per-sample (BN-free) stand-in encoder, so it is dropped (#11).
    stats, k_feat = fused_forward(im_q, im_k, params_q, params_k, queue, temp)

    loss = jnp.mean(stats[:, 0])          # F.cross_entropy mean reduction
    acc = 100.0 * jnp.mean(stats[:, 1])   # accuracy(...)[0] in percent

    queue, queue_ptr = dequeue_and_enqueue(queue, k_feat, queue_ptr)
    return (loss, acc), (params_k, queue, queue_ptr)


# ----------------------------------------------------------------------------
# Deterministic parameter construction (stand-in for ResNet + projector).
# ----------------------------------------------------------------------------
def make_encoder_params(key, c_in, dim_mlp, dim):
    ks = jax.random.split(key, 6)
    wb = jax.random.normal(ks[0], (c_in, dim_mlp), jnp.float32) * 0.1
    bb = jax.random.normal(ks[1], (1, dim_mlp), jnp.float32) * 0.01
    w1 = jax.random.normal(ks[2], (dim_mlp, dim_mlp), jnp.float32) * 0.1
    b1 = jax.random.normal(ks[3], (1, dim_mlp), jnp.float32) * 0.01
    w2 = jax.random.normal(ks[4], (dim_mlp, dim), jnp.float32) * 0.1
    b2 = jax.random.normal(ks[5], (1, dim), jnp.float32) * 0.01
    return (wb, bb, w1, b1, w2, b2)


if __name__ == "__main__":
    N, C, H, W = 16, 4, 16, 16    # images for the stand-in backbone
    DIM_MLP = 32                  # hidden width of the stand-in projector
    DIM = 128                     # feature dimension (module default)
    K = 512                       # queue size (K % N == 0), 2 K-blocks
    M = 0.999
    T = 0.2                       # MosRep default temperature

    root = jax.random.PRNGKey(0)
    k_im_q, k_im_k, k_enc, k_queue = jax.random.split(root, 4)

    im_q = jax.random.normal(k_im_q, (N, C, H, W), jnp.float32)
    im_k = jax.random.normal(k_im_k, (N, C, H, W), jnp.float32)

    params_q = make_encoder_params(k_enc, C, DIM_MLP, DIM)
    params_k = tuple(params_q)    # key encoder initialized == query encoder

    # Queue stored (K, dim) bf16: row i = one unit-norm negative key
    # (equivalent to the reference's (dim, K) buffer normalized along dim=0).
    queue = jax.random.normal(k_queue, (K, DIM), jnp.float32)
    queue = queue / jnp.linalg.norm(queue, axis=1, keepdims=True)
    queue = queue.astype(jnp.bfloat16)
    queue_ptr = jnp.zeros((1,), jnp.int32)

    fwd = jax.jit(functools.partial(mosrep_forward, m=M, temp=T),
                  donate_argnums=(4,))    # donate the queue: true in-place update

    (loss, acc), (params_k, queue, queue_ptr) = fwd(
        im_q, im_k, params_q, params_k, queue, queue_ptr)

    jax.block_until_ready((loss, acc, queue, queue_ptr))
    assert jnp.isfinite(loss) and jnp.isfinite(acc)
    print("KERNEL_OK")
</pallas_src>

<mosaic_0001>
module attributes {stable_mosaic.version = 11 : i64} {
  func.func @_enqueue_kernel(%arg0: memref<1xi32, #tpu.memory_space<smem>>, %arg1: memref<16x128xbf16, #tpu.memory_space<vmem>>, %arg2: memref<512x128xbf16, #tpu.memory_space<any>>, %arg3: memref<512x128xbf16, #tpu.memory_space<any>>, %arg4: memref<!tpu.dma_semaphore, #tpu.memory_space<semaphore_mem>>) attributes {dimension_semantics = [], scalar_prefetch = 0 : i64, scratch_operands = 1 : i64, tpu.core_type = #tpu.core_type<tc>} {
    %c0 = arith.constant 0 : index
    %0 = memref.load %arg0[%c0] : memref<1xi32, #tpu.memory_space<smem>>
    %1 = tpu.assume_multiple %0, 16 : i32
    %c0_i32 = arith.constant 0 : i32
    %2 = tpu.memref_slice %arg3[%1, %c0_i32] : memref<512x128xbf16, #tpu.memory_space<any>> -> memref<16x128xbf16, #tpu.memory_space<any>>
    tpu.enqueue_dma source(%arg1 : memref<16x128xbf16, #tpu.memory_space<vmem>>) target(%2 : memref<16x128xbf16, #tpu.memory_space<any>>) target_semaphore(%arg4 : memref<!tpu.dma_semaphore, #tpu.memory_space<semaphore_mem>>)
    %c0_i32_0 = arith.constant 0 : i32
    %3 = tpu.memref_slice %arg3[%1, %c0_i32_0] : memref<512x128xbf16, #tpu.memory_space<any>> -> memref<16x128xbf16, #tpu.memory_space<any>>
    tpu.wait_dma2 semaphore(%arg4 : memref<!tpu.dma_semaphore, #tpu.memory_space<semaphore_mem>>) src(%arg1 : memref<16x128xbf16, #tpu.memory_space<vmem>>) dst(%3 : memref<16x128xbf16, #tpu.memory_space<any>>)
    return
  }
}

module attributes {stable_mosaic.version = 11 : i64} {
  func.func @_fused_kernel(%arg0: i32, %arg1: i32, %arg2: memref<8x8x256xf32, #tpu.memory_space<vmem>>, %arg3: memref<8x8x256xf32, #tpu.memory_space<vmem>>, %arg4: memref<8x32xbf16, #tpu.memory_space<vmem>>, %arg5: memref<1x32xf32, #tpu.memory_space<vmem>>, %arg6: memref<32x32xbf16, #tpu.memory_space<vmem>>, %arg7: memref<1x32xf32, #tpu.memory_space<vmem>>, %arg8: memref<32x128xbf16, #tpu.memory_space<vmem>>, %arg9: memref<1x128xf32, #tpu.memory_space<vmem>>, %arg10: memref<8x32xbf16, #tpu.memory_space<vmem>>, %arg11: memref<1x32xf32, #tpu.memory_space<vmem>>, %arg12: memref<32x32xbf16, #tpu.memory_space<vmem>>, %arg13: memref<1x32xf32, #tpu.memory_space<vmem>>, %arg14: memref<32x128xbf16, #tpu.memory_space<vmem>>, %arg15: memref<1x128xf32, #tpu.memory_space<vmem>>, %arg16: memref<256x128xbf16, #tpu.memory_space<vmem>>, %arg17: memref<8x2xf32, #tpu.memory_space<vmem>>, %arg18: memref<8x128xf32, #tpu.memory_space<vmem>>, %arg19: memref<8x128xf32, #tpu.memory_space<vmem>>, %arg20: memref<8x1xf32, #tpu.memory_space<vmem>>, %arg21: memref<8x1xf32, #tpu.memory_space<vmem>>, %arg22: memref<8x1xf32, #tpu.memory_space<vmem>>) attributes {dimension_semantics = [#tpu.dimension_semantics<parallel>, #tpu.dimension_semantics<arbitrary>], iteration_bounds = array<i64: 2, 2>, scalar_prefetch = 0 : i64, scratch_operands = 4 : i64, tpu.core_type = #tpu.core_type<tc>, window_params = [{transform_indices = @transform_0, window_bounds = array<i64: 8, 8, 256>}, {transform_indices = @transform_1, window_bounds = array<i64: 8, 8, 256>}, {pipeline_mode = #tpu.pipeline_mode<synchronous>, transform_indices = @transform_2, window_bounds = array<i64: 8, 32>}, {pipeline_mode = #tpu.pipeline_mode<synchronous>, transform_indices = @transform_3, window_bounds = array<i64: 1, 32>}, {pipeline_mode = #tpu.pipeline_mode<synchronous>, transform_indices = @transform_4, window_bounds = array<i64: 32, 32>}, {pipeline_mode = #tpu.pipeline_mode<synchronous>, transform_indices = @transform_5, window_bounds = array<i64: 1, 32>}, {pipeline_mode = #tpu.pipeline_mode<synchronous>, transform_indices = @transform_6, window_bounds = array<i64: 32, 128>}, {pipeline_mode = #tpu.pipeline_mode<synchronous>, transform_indices = @transform_7, window_bounds = array<i64: 1, 128>}, {pipeline_mode = #tpu.pipeline_mode<synchronous>, transform_indices = @transform_8, window_bounds = array<i64: 8, 32>}, {pipeline_mode = #tpu.pipeline_mode<synchronous>, transform_indices = @transform_9, window_bounds = array<i64: 1, 32>}, {pipeline_mode = #tpu.pipeline_mode<synchronous>, transform_indices = @transform_10, window_bounds = array<i64: 32, 32>}, {pipeline_mode = #tpu.pipeline_mode<synchronous>, transform_indices = @transform_11, window_bounds = array<i64: 1, 32>}, {pipeline_mode = #tpu.pipeline_mode<synchronous>, transform_indices = @transform_12, window_bounds = array<i64: 32, 128>}, {pipeline_mode = #tpu.pipeline_mode<synchronous>, transform_indices = @transform_13, window_bounds = array<i64: 1, 128>}, {transform_indices = @transform_14, window_bounds = array<i64: 256, 128>}, {transform_indices = @transform_15, window_bounds = array<i64: 8, 2>}, {transform_indices = @transform_16, window_bounds = array<i64: 8, 128>}]} {
    %c0_i32 = arith.constant 0 : i32
    %0 = arith.cmpi eq, %arg1, %c0_i32 : i32
    %1 = arith.extui %0 : i1 to i32
    %c0_i32_0 = arith.constant 0 : i32
    %2 = arith.cmpi ne, %1, %c0_i32_0 : i32
    scf.if %2 {
      %c0_17 = arith.constant 0 : index
      %c0_18 = arith.constant 0 : index
      %c0_19 = arith.constant 0 : index
      %27 = vector.load %arg2[%c0_17, %c0_18, %c0_19] : memref<8x8x256xf32, #tpu.memory_space<vmem>>, vector<8x8x256xf32>
      %cst_20 = arith.constant dense<0.000000e+00> : vector<8x8xf32>
      %28 = vector.multi_reduction <add>, %27, %cst_20 [2] : vector<8x8x256xf32> to vector<8x8xf32>
      %cst_21 = arith.constant 3.906250e-03 : f32
      %29 = vector.broadcast %cst_21 : f32 to vector<8x8xf32>
      %30 = arith.mulf %28, %29 : vector<8x8xf32>
      %31 = arith.truncf %30 : vector<8x8xf32> to vector<8x8xbf16>
      %c0_22 = arith.constant 0 : index
      %c0_23 = arith.constant 0 : index
      %32 = vector.load %arg4[%c0_22, %c0_23] : memref<8x32xbf16, #tpu.memory_space<vmem>>, vector<8x32xbf16>
      %cst_24 = arith.constant dense<0.000000e+00> : vector<8x32xf32>
      %33 = tpu.matmul %31, %32, %cst_24 {dimension_numbers = #tpu.dot_dimension_numbers<[1], [0], [0], [1], [0, 0, 1, 1], [], []>} : vector<8x8xbf16>, vector<8x32xbf16>, vector<8x32xf32> -> vector<8x32xf32>
      %c0_25 = arith.constant 0 : index
      %c0_26 = arith.constant 0 : index
      %34 = vector.load %arg5[%c0_25, %c0_26] : memref<1x32xf32, #tpu.memory_space<vmem>>, vector<1x32xf32>
      %35 = vector.broadcast %34 : vector<1x32xf32> to vector<8x32xf32>
      %36 = arith.addf %33, %35 : vector<8x32xf32>
      %37 = arith.truncf %36 : vector<8x32xf32> to vector<8x32xbf16>
      %c0_27 = arith.constant 0 : index
      %c0_28 = arith.constant 0 : index
      %38 = vector.load %arg6[%c0_27, %c0_28] : memref<32x32xbf16, #tpu.memory_space<vmem>>, vector<32x32xbf16>
      %cst_29 = arith.constant dense<0.000000e+00> : vector<8x32xf32>
      %39 = tpu.matmul %37, %38, %cst_29 {dimension_numbers = #tpu.dot_dimension_numbers<[1], [0], [0], [1], [0, 0, 1, 1], [], []>} : vector<8x32xbf16>, vector<32x32xbf16>, vector<8x32xf32> -> vector<8x32xf32>
      %c0_30 = arith.constant 0 : index
      %c0_31 = arith.constant 0 : index
      %40 = vector.load %arg7[%c0_30, %c0_31] : memref<1x32xf32, #tpu.memory_space<vmem>>, vector<1x32xf32>
      %41 = vector.broadcast %40 : vector<1x32xf32> to vector<8x32xf32>
      %42 = arith.addf %39, %41 : vector<8x32xf32>
      %cst_32 = arith.constant 0.000000e+00 : f32
      %43 = vector.broadcast %cst_32 : f32 to vector<8x32xf32>
      %44 = arith.maximumf %42, %43 : vector<8x32xf32>
      %45 = arith.truncf %44 : vector<8x32xf32> to vector<8x32xbf16>
      %c0_33 = arith.constant 0 : index
      %c0_34 = arith.constant 0 : index
      %46 = vector.load %arg8[%c0_33, %c0_34] : memref<32x128xbf16, #tpu.memory_space<vmem>>, vector<32x128xbf16>
      %cst_35 = arith.constant dense<0.000000e+00> : vector<8x128xf32>
      %47 = tpu.matmul %45, %46, %cst_35 {dimension_numbers = #tpu.dot_dimension_numbers<[1], [0], [0], [1], [0, 0, 1, 1], [], []>} : vector<8x32xbf16>, vector<32x128xbf16>, vector<8x128xf32> -> vector<8x128xf32>
      %c0_36 = arith.constant 0 : index
      %c0_37 = arith.constant 0 : index
      %48 = vector.load %arg9[%c0_36, %c0_37] : memref<1x128xf32, #tpu.memory_space<vmem>>, vector<1x128xf32>
      %49 = vector.broadcast %48 : vector<1x128xf32> to vector<8x128xf32>
      %50 = arith.addf %47, %49 : vector<8x128xf32>
      %51 = arith.mulf %50, %50 : vector<8x128xf32>
      %cst_38 = arith.constant dense<0.000000e+00> : vector<8xf32>
      %52 = vector.multi_reduction <add>, %51, %cst_38 [1] : vector<8x128xf32> to vector<8xf32>
      %53 = vector.shape_cast %52 : vector<8xf32> to vector<8x1xf32>
      %cst_39 = arith.constant 1.000000e-24 : f32
      %54 = vector.broadcast %cst_39 : f32 to vector<8x1xf32>
      %55 = arith.maximumf %53, %54 : vector<8x1xf32>
      %56 = math.rsqrt %55 : vector<8x1xf32>
      %57 = vector.broadcast %56 : vector<8x1xf32> to vector<8x128xf32>
      %58 = arith.mulf %50, %57 : vector<8x128xf32>
      %c0_40 = arith.constant 0 : index
      %c0_41 = arith.constant 0 : index
      %c0_42 = arith.constant 0 : index
      %59 = vector.load %arg3[%c0_40, %c0_41, %c0_42] : memref<8x8x256xf32, #tpu.memory_space<vmem>>, vector<8x8x256xf32>
      %cst_43 = arith.constant dense<0.000000e+00> : vector<8x8xf32>
      %60 = vector.multi_reduction <add>, %59, %cst_43 [2] : vector<8x8x256xf32> to vector<8x8xf32>
      %cst_44 = arith.constant 3.906250e-03 : f32
      %61 = vector.broadcast %cst_44 : f32 to vector<8x8xf32>
      %62 = arith.mulf %60, %61 : vector<8x8xf32>
      %63 = arith.truncf %62 : vector<8x8xf32> to vector<8x8xbf16>
      %c0_45 = arith.constant 0 : index
      %c0_46 = arith.constant 0 : index
      %64 = vector.load %arg10[%c0_45, %c0_46] : memref<8x32xbf16, #tpu.memory_space<vmem>>, vector<8x32xbf16>
      %cst_47 = arith.constant dense<0.000000e+00> : vector<8x32xf32>
      %65 = tpu.matmul %63, %64, %cst_47 {dimension_numbers = #tpu.dot_dimension_numbers<[1], [0], [0], [1], [0, 0, 1, 1], [], []>} : vector<8x8xbf16>, vector<8x32xbf16>, vector<8x32xf32> -> vector<8x32xf32>
      %c0_48 = arith.constant 0 : index
      %c0_49 = arith.constant 0 : index
      %66 = vector.load %arg11[%c0_48, %c0_49] : memref<1x32xf32, #tpu.memory_space<vmem>>, vector<1x32xf32>
      %67 = vector.broadcast %66 : vector<1x32xf32> to vector<8x32xf32>
      %68 = arith.addf %65, %67 : vector<8x32xf32>
      %69 = arith.truncf %68 : vector<8x32xf32> to vector<8x32xbf16>
      %c0_50 = arith.constant 0 : index
      %c0_51 = arith.constant 0 : index
      %70 = vector.load %arg12[%c0_50, %c0_51] : memref<32x32xbf16, #tpu.memory_space<vmem>>, vector<32x32xbf16>
      %cst_52 = arith.constant dense<0.000000e+00> : vector<8x32xf32>
      %71 = tpu.matmul %69, %70, %cst_52 {dimension_numbers = #tpu.dot_dimension_numbers<[1], [0], [0], [1], [0, 0, 1, 1], [], []>} : vector<8x32xbf16>, vector<32x32xbf16>, vector<8x32xf32> -> vector<8x32xf32>
      %c0_53 = arith.constant 0 : index
      %c0_54 = arith.constant 0 : index
      %72 = vector.load %arg13[%c0_53, %c0_54] : memref<1x32xf32, #tpu.memory_space<vmem>>, vector<1x32xf32>
      %73 = vector.broadcast %72 : vector<1x32xf32> to vector<8x32xf32>
      %74 = arith.addf %71, %73 : vector<8x32xf32>
      %cst_55 = arith.constant 0.000000e+00 : f32
      %75 = vector.broadcast %cst_55 : f32 to vector<8x32xf32>
      %76 = arith.maximumf %74, %75 : vector<8x32xf32>
      %77 = arith.truncf %76 : vector<8x32xf32> to vector<8x32xbf16>
      %c0_56 = arith.constant 0 : index
      %c0_57 = arith.constant 0 : index
      %78 = vector.load %arg14[%c0_56, %c0_57] : memref<32x128xbf16, #tpu.memory_space<vmem>>, vector<32x128xbf16>
      %cst_58 = arith.constant dense<0.000000e+00> : vector<8x128xf32>
      %79 = tpu.matmul %77, %78, %cst_58 {dimension_numbers = #tpu.dot_dimension_numbers<[1], [0], [0], [1], [0, 0, 1, 1], [], []>} : vector<8x32xbf16>, vector<32x128xbf16>, vector<8x128xf32> -> vector<8x128xf32>
      %c0_59 = arith.constant 0 : index
      %c0_60 = arith.constant 0 : index
      %80 = vector.load %arg15[%c0_59, %c0_60] : memref<1x128xf32, #tpu.memory_space<vmem>>, vector<1x128xf32>
      %81 = vector.broadcast %80 : vector<1x128xf32> to vector<8x128xf32>
      %82 = arith.addf %79, %81 : vector<8x128xf32>
      %83 = arith.mulf %82, %82 : vector<8x128xf32>
      %cst_61 = arith.constant dense<0.000000e+00> : vector<8xf32>
      %84 = vector.multi_reduction <add>, %83, %cst_61 [1] : vector<8x128xf32> to vector<8xf32>
      %85 = vector.shape_cast %84 : vector<8xf32> to vector<8x1xf32>
      %cst_62 = arith.constant 1.000000e-24 : f32
      %86 = vector.broadcast %cst_62 : f32 to vector<8x1xf32>
      %87 = arith.maximumf %85, %86 : vector<8x1xf32>
      %88 = math.rsqrt %87 : vector<8x1xf32>
      %89 = vector.broadcast %88 : vector<8x1xf32> to vector<8x128xf32>
      %90 = arith.mulf %82, %89 : vector<8x128xf32>
      %cst_63 = arith.constant 5.000000e+00 : f32
      %91 = vector.broadcast %cst_63 : f32 to vector<8x128xf32>
      %92 = arith.mulf %58, %91 : vector<8x128xf32>
      %c0_64 = arith.constant 0 : index
      %c0_65 = arith.constant 0 : index
      %93 = vector.load %arg19[%c0_64, %c0_65] : memref<8x128xf32, #tpu.memory_space<vmem>>, vector<8x128xf32>
      tpu.vector_store %arg19[%c0_64, %c0_65], %92 {strides = array<i32>} : memref<8x128xf32, #tpu.memory_space<vmem>>, vector<8x128xf32>,
      %c0_66 = arith.constant 0 : index
      %c0_67 = arith.constant 0 : index
      %94 = vector.load %arg18[%c0_66, %c0_67] : memref<8x128xf32, #tpu.memory_space<vmem>>, vector<8x128xf32>
      tpu.vector_store %arg18[%c0_66, %c0_67], %90 {strides = array<i32>} : memref<8x128xf32, #tpu.memory_space<vmem>>, vector<8x128xf32>,
      %95 = arith.mulf %92, %90 : vector<8x128xf32>
      %cst_68 = arith.constant dense<0.000000e+00> : vector<8xf32>
      %96 = vector.multi_reduction <add>, %95, %cst_68 [1] : vector<8x128xf32> to vector<8xf32>
      %97 = vector.shape_cast %96 : vector<8xf32> to vector<8x1xf32>
      %c0_69 = arith.constant 0 : index
      %c0_70 = arith.constant 0 : index
      %98 = vector.load %arg20[%c0_69, %c0_70] : memref<8x1xf32, #tpu.memory_space<vmem>>, vector<8x1xf32>
      tpu.vector_store %arg20[%c0_69, %c0_70], %97 {strides = array<i32>} : memref<8x1xf32, #tpu.memory_space<vmem>>, vector<8x1xf32>,
      %cst_71 = arith.constant 0xFF800000 : f32
      %99 = vector.broadcast %cst_71 : f32 to vector<8x1xf32>
      %c0_72 = arith.constant 0 : index
      %c0_73 = arith.constant 0 : index
      %100 = vector.load %arg21[%c0_72, %c0_73] : memref<8x1xf32, #tpu.memory_space<vmem>>, vector<8x1xf32>
      tpu.vector_store %arg21[%c0_72, %c0_73], %99 {strides = array<i32>} : memref<8x1xf32, #tpu.memory_space<vmem>>, vector<8x1xf32>,
      %cst_74 = arith.constant 0.000000e+00 : f32
      %101 = vector.broadcast %cst_74 : f32 to vector<8x1xf32>
      %c0_75 = arith.constant 0 : index
      %c0_76 = arith.constant 0 : index
      %102 = vector.load %arg22[%c0_75, %c0_76] : memref<8x1xf32, #tpu.memory_space<vmem>>, vector<8x1xf32>
      tpu.vector_store %arg22[%c0_75, %c0_76], %101 {strides = array<i32>} : memref<8x1xf32, #tpu.memory_space<vmem>>, vector<8x1xf32>,
    } else {
    }
    %c0 = arith.constant 0 : index
    %c0_1 = arith.constant 0 : index
    %3 = vector.load %arg19[%c0, %c0_1] : memref<8x128xf32, #tpu.memory_space<vmem>>, vector<8x128xf32>
    %4 = arith.truncf %3 : vector<8x128xf32> to vector<8x128xbf16>
    %c0_2 = arith.constant 0 : index
    %c0_3 = arith.constant 0 : index
    %5 = vector.load %arg16[%c0_2, %c0_3] : memref<256x128xbf16, #tpu.memory_space<vmem>>, vector<256x128xbf16>
    %cst = arith.constant dense<0.000000e+00> : vector<8x256xf32>
    %6 = tpu.matmul %4, %5, %cst {dimension_numbers = #tpu.dot_dimension_numbers<[1], [1], [0], [0], [0, 0, 1, 0], [], []>} : vector<8x128xbf16>, vector<256x128xbf16>, vector<8x256xf32> -> vector<8x256xf32>
    %cst_4 = arith.constant dense<0xFF800000> : vector<8xf32>
    %7 = vector.multi_reduction <maximumf>, %6, %cst_4 [1] : vector<8x256xf32> to vector<8xf32>
    %8 = vector.shape_cast %7 : vector<8xf32> to vector<8x1xf32>
    %c0_5 = arith.constant 0 : index
    %c0_6 = arith.constant 0 : index
    %9 = vector.load %arg21[%c0_5, %c0_6] : memref<8x1xf32, #tpu.memory_space<vmem>>, vector<8x1xf32>
    %10 = arith.maximumf %9, %8 : vector<8x1xf32>
    %c0_7 = arith.constant 0 : index
    %c0_8 = arith.constant 0 : index
    %11 = vector.load %arg22[%c0_7, %c0_8] : memref<8x1xf32, #tpu.memory_space<vmem>>, vector<8x1xf32>
    %c0_9 = arith.constant 0 : index
    %c0_10 = arith.constant 0 : index
    %12 = vector.load %arg21[%c0_9, %c0_10] : memref<8x1xf32, #tpu.memory_space<vmem>>, vector<8x1xf32>
    %13 = arith.subf %12, %10 : vector<8x1xf32>
    %14 = math.exp %13 : vector<8x1xf32>
    %15 = arith.mulf %11, %14 : vector<8x1xf32>
    %16 = vector.broadcast %10 : vector<8x1xf32> to vector<8x256xf32>
    %17 = arith.subf %6, %16 : vector<8x256xf32>
    %18 = math.exp %17 : vector<8x256xf32>
    %cst_11 = arith.constant dense<0.000000e+00> : vector<8xf32>
    %19 = vector.multi_reduction <add>, %18, %cst_11 [1] : vector<8x256xf32> to vector<8xf32>
    %20 = vector.shape_cast %19 : vector<8xf32> to vector<8x1xf32>
    %21 = arith.addf %15, %20 : vector<8x1xf32>
    %c0_12 = arith.constant 0 : index
    %c0_13 = arith.constant 0 : index
    %22 = vector.load %arg22[%c0_12, %c0_13] : memref<8x1xf32, #tpu.memory_space<vmem>>, vector<8x1xf32>
    tpu.vector_store %arg22[%c0_12, %c0_13], %21 {strides = array<i32>} : memref<8x1xf32, #tpu.memory_space<vmem>>, vector<8x1xf32>,
    %c0_14 = arith.constant 0 : index
    %c0_15 = arith.constant 0 : index
    %23 = vector.load %arg21[%c0_14, %c0_15] : memref<8x1xf32, #tpu.memory_space<vmem>>, vector<8x1xf32>
    tpu.vector_store %arg21[%c0_14, %c0_15], %10 {strides = array<i32>} : memref<8x1xf32, #tpu.memory_space<vmem>>, vector<8x1xf32>,
    %c1_i32 = arith.constant 1 : i32
    %24 = arith.cmpi eq, %arg1, %c1_i32 : i32
    %25 = arith.extui %24 : i1 to i32
    %c0_i32_16 = arith.constant 0 : i32
    %26 = arith.cmpi ne, %25, %c0_i32_16 : i32
    scf.if %26 {
      %c0_17 = arith.constant 0 : index
      %c0_18 = arith.constant 0 : index
      %27 = vector.load %arg20[%c0_17, %c0_18] : memref<8x1xf32, #tpu.memory_space<vmem>>, vector<8x1xf32>
      %c0_19 = arith.constant 0 : index
      %c0_20 = arith.constant 0 : index
      %28 = vector.load %arg21[%c0_19, %c0_20] : memref<8x1xf32, #tpu.memory_space<vmem>>, vector<8x1xf32>
      %29 = arith.maximumf %28, %27 : vector<8x1xf32>
      %c0_21 = arith.constant 0 : index
      %c0_22 = arith.constant 0 : index
      %30 = vector.load %arg22[%c0_21, %c0_22] : memref<8x1xf32, #tpu.memory_space<vmem>>, vector<8x1xf32>
      %31 = arith.subf %28, %29 : vector<8x1xf32>
      %32 = math.exp %31 : vector<8x1xf32>
      %33 = arith.mulf %30, %32 : vector<8x1xf32>
      %34 = arith.subf %27, %29 : vector<8x1xf32>
      %35 = math.exp %34 : vector<8x1xf32>
      %36 = arith.addf %33, %35 : vector<8x1xf32>
      %37 = math.log %36 : vector<8x1xf32>
      %38 = arith.addf %37, %29 : vector<8x1xf32>
      %39 = arith.subf %38, %27 : vector<8x1xf32>
      %c0_23 = arith.constant 0 : index
      %c0_24 = arith.constant 0 : index
      %40 = vector.load %arg17[%c0_23, %c0_24] : memref<8x2xf32, #tpu.memory_space<vmem>>, vector<8x1xf32>
      tpu.vector_store %arg17[%c0_23, %c0_24], %39 {strides = array<i32>} : memref<8x2xf32, #tpu.memory_space<vmem>>, vector<8x1xf32>,
      %41 = arith.cmpf oge, %27, %28 : vector<8x1xf32>
      %42 = arith.extui %41 : vector<8x1xi1> to vector<8x1xi32>
      %43 = arith.sitofp %42 : vector<8x1xi32> to vector<8x1xf32>
      %c0_25 = arith.constant 0 : index
      %c1 = arith.constant 1 : index
      %44 = vector.load %arg17[%c0_25, %c1] : memref<8x2xf32, #tpu.memory_space<vmem>>, vector<8x1xf32>
      tpu.vector_store %arg17[%c0_25, %c1], %43 {strides = array<i32>} : memref<8x2xf32, #tpu.memory_space<vmem>>, vector<8x1xf32>,
    } else {
    }
    return
  }
  func.func @transform_0(%arg0: i32, %arg1: i32) -> (i32, i32, i32) {
    %c0_i32 = arith.constant 0 : i32
    %c0_i32_0 = arith.constant 0 : i32
    %c0_i32_1 = arith.constant 0 : i32
    return %arg0, %c0_i32, %c0_i32_0 : i32, i32, i32
  }
  func.func @transform_1(%arg0: i32, %arg1: i32) -> (i32, i32, i32) {
    %c0_i32 = arith.constant 0 : i32
    %c0_i32_0 = arith.constant 0 : i32
    %c0_i32_1 = arith.constant 0 : i32
    return %arg0, %c0_i32, %c0_i32_0 : i32, i32, i32
  }
  func.func @transform_2(%arg0: i32, %arg1: i32) -> (i32, i32) {
    %c0_i32 = arith.constant 0 : i32
    %c0_i32_0 = arith.constant 0 : i32
    %c0_i32_1 = arith.constant 0 : i32
    return %c0_i32, %c0_i32_0 : i32, i32
  }
  func.func @transform_3(%arg0: i32, %arg1: i32) -> (i32, i32) {
    %c0_i32 = arith.constant 0 : i32
    %c0_i32_0 = arith.constant 0 : i32
    %c0_i32_1 = arith.constant 0 : i32
    return %c0_i32, %c0_i32_0 : i32, i32
  }
  func.func @transform_4(%arg0: i32, %arg1: i32) -> (i32, i32) {
    %c0_i32 = arith.constant 0 : i32
    %c0_i32_0 = arith.constant 0 : i32
    %c0_i32_1 = arith.constant 0 : i32
    return %c0_i32, %c0_i32_0 : i32, i32
  }
  func.func @transform_5(%arg0: i32, %arg1: i32) -> (i32, i32) {
    %c0_i32 = arith.constant 0 : i32
    %c0_i32_0 = arith.constant 0 : i32
    %c0_i32_1 = arith.constant 0 : i32
    return %c0_i32, %c0_i32_0 : i32, i32
  }
  func.func @transform_6(%arg0: i32, %arg1: i32) -> (i32, i32) {
    %c0_i32 = arith.constant 0 : i32
    %c0_i32_0 = arith.constant 0 : i32
    %c0_i32_1 = arith.constant 0 : i32
    return %c0_i32, %c0_i32_0 : i32, i32
  }
  func.func @transform_7(%arg0: i32, %arg1: i32) -> (i32, i32) {
    %c0_i32 = arith.constant 0 : i32
    %c0_i32_0 = arith.constant 0 : i32
    %c0_i32_1 = arith.constant 0 : i32
    return %c0_i32, %c0_i32_0 : i32, i32
  }
  func.func @transform_8(%arg0: i32, %arg1: i32) -> (i32, i32) {
    %c0_i32 = arith.constant 0 : i32
    %c0_i32_0 = arith.constant 0 : i32
    %c0_i32_1 = arith.constant 0 : i32
    return %c0_i32, %c0_i32_0 : i32, i32
  }
  func.func @transform_9(%arg0: i32, %arg1: i32) -> (i32, i32) {
    %c0_i32 = arith.constant 0 : i32
    %c0_i32_0 = arith.constant 0 : i32
    %c0_i32_1 = arith.constant 0 : i32
    return %c0_i32, %c0_i32_0 : i32, i32
  }
  func.func @transform_10(%arg0: i32, %arg1: i32) -> (i32, i32) {
    %c0_i32 = arith.constant 0 : i32
    %c0_i32_0 = arith.constant 0 : i32
    %c0_i32_1 = arith.constant 0 : i32
    return %c0_i32, %c0_i32_0 : i32, i32
  }
  func.func @transform_11(%arg0: i32, %arg1: i32) -> (i32, i32) {
    %c0_i32 = arith.constant 0 : i32
    %c0_i32_0 = arith.constant 0 : i32
    %c0_i32_1 = arith.constant 0 : i32
    return %c0_i32, %c0_i32_0 : i32, i32
  }
  func.func @transform_12(%arg0: i32, %arg1: i32) -> (i32, i32) {
    %c0_i32 = arith.constant 0 : i32
    %c0_i32_0 = arith.constant 0 : i32
    %c0_i32_1 = arith.constant 0 : i32
    return %c0_i32, %c0_i32_0 : i32, i32
  }
  func.func @transform_13(%arg0: i32, %arg1: i32) -> (i32, i32) {
    %c0_i32 = arith.constant 0 : i32
    %c0_i32_0 = arith.constant 0 : i32
    %c0_i32_1 = arith.constant 0 : i32
    return %c0_i32, %c0_i32_0 : i32, i32
  }
  func.func @transform_14(%arg0: i32, %arg1: i32) -> (i32, i32) {
    %c0_i32 = arith.constant 0 : i32
    %c0_i32_0 = arith.constant 0 : i32
    return %arg1, %c0_i32 : i32, i32
  }
  func.func @transform_15(%arg0: i32, %arg1: i32) -> (i32, i32) {
    %c0_i32 = arith.constant 0 : i32
    %c0_i32_0 = arith.constant 0 : i32
    return %arg0, %c0_i32 : i32, i32
  }
  func.func @transform_16(%arg0: i32, %arg1: i32) -> (i32, i32) {
    %c0_i32 = arith.constant 0 : i32
    %c0_i32_0 = arith.constant 0 : i32
    return %arg0, %c0_i32 : i32, i32
  }
}

</mosaic_0001>

<bundles_post_ra>
// kernel: mosrep_forward.3
= control target key start
LH: loop header
LB: loop body
LE: loop exit
PB: predicated region body
PF: predicated region fallthrough
CT: control target
= control target key end

     0   :  { %s114_s0 = inlined_call_operand.<no memory space> [shape: s32[1], index: 0, kind: input, shape index: {}]   ;;  %s115_s1 = inlined_call_operand.vmem [shape: bf16[16,128], index: 1, kind: input, shape index: {}]   ;;  %s116_s2 = inlined_call_operand.vmem [shape: bf16[512,128], index: 2, kind: input, shape index: {}, may-alias: {2,3}]   ;;  %s117_s3 = inlined_call_operand.vmem [shape: bf16[512,128], index: 3, kind: output, shape index: {}, may-alias: {2,3}]  }
   0x1   :  { %s14_s14 = sshra.s32 %s114_s0, 3  ;;  %v51_v0 = vld [vmem:[%s115_s1] sm:$0xff] }
   0x2   :  { %s81_s17 = sshll.u32 %s14_s14, 2 }
   0x3   :  { %s17_s20 = scalar_lea.vmem %s117_s3, %s81_s17 }
   0x4   :  { %52 = vst [vmem:[%s17_s20] sm:$0xff] %v51_v0 }
   0x5   :  { %60 = vsyncadd [#allocation2], 128 }
   0x6   :  { %83 = dma.done.wait [#allocation2], 128 }
   0x7   :  { %84 = vsyncadd [#allocation2], 4294967168 }
   0x8   :  { %65 = vsyncmov [#allocation2] }
   0xb   :  { %s66_s2 = vpop.sfrf %65 }
   0xc   :  { %p82_p0 = scmp.ne.s32.totalorder %s66_s2, 0 }
   0xe   :  { %70 = shalt.err (%p82_p0)  }

// kernel: mosrep_forward.2
= control target key start
LH: loop header
LB: loop body
LE: loop exit
PB: predicated region body
PF: predicated region fallthrough
CT: control target
= control target key end

     0   :  { %s1938_s21 = smov 0   ;;  %s1940_s22 = smov 0   ;;  %s2178_s0 = inlined_call_operand.vmem [shape: f32[16,8,256], index: 0, kind: input, shape index: {}]   ;;  %s2179_s1 = inlined_call_operand.vmem [shape: f32[16,8,256], index: 1, kind: input, shape index: {}]   ;;  %s2180_s2 = inlined_call_operand.vmem [shape: bf16[8,32], index: 2, kind: input, shape index: {}]   ;;  %s2181_s3 = inlined_call_operand.vmem [shape: f32[1,32], index: 3, kind: input, shape index: {}]   ;;  %s2182_s4 = inlined_call_operand.vmem [shape: bf16[32,32], index: 4, kind: input, shape index: {}]   ;;  %s2183_s5 = inlined_call_operand.vmem [shape: f32[1,32], index: 5, kind: input, shape index: {}]   ;;  %s2184_s6 = inlined_call_operand.vmem [shape: bf16[32,128], index: 6, kind: input, shape index: {}]   ;;  %s2185_s7 = inlined_call_operand.vmem [shape: f32[1,128], index: 7, kind: input, shape index: {}]   ;;  %s2186_s8 = inlined_call_operand.vmem [shape: bf16[8,32], index: 8, kind: input, shape index: {}]   ;;  %s2187_s9 = inlined_call_operand.vmem [shape: f32[1,32], index: 9, kind: input, shape index: {}]   ;;  %s2188_s10 = inlined_call_operand.vmem [shape: bf16[32,32], index: 10, kind: input, shape index: {}]   ;;  %s2189_s11 = inlined_call_operand.vmem [shape: f32[1,32], index: 11, kind: input, shape index: {}]   ;;  %s2190_s12 = inlined_call_operand.vmem [shape: bf16[32,128], index: 12, kind: input, shape index: {}]   ;;  %s2191_s13 = inlined_call_operand.vmem [shape: f32[1,128], index: 13, kind: input, shape index: {}]   ;;  %s2192_s14 = inlined_call_operand.vmem [shape: bf16[512,128], index: 14, kind: input, shape index: {}]   ;;  %s2193_s15 = inlined_call_operand.vmem [shape: f32[16,2], index: 15, kind: output, shape index: {0}]   ;;  %s2194_s16 = inlined_call_operand.vmem [shape: f32[16,128], index: 16, kind: output, shape index: {1}]  }
   0x1   :  { %2199 = sst [smem:[#allocation11_spill]] %s2178_s0  ;;  %s1942_s23 = smov 0  }
   0x2   :  { %2200 = sst [smem:[#allocation12_spill]] %s2185_s7  ;;  %s1944_s24 = smov 0  }
   0x3   :  { %2201 = sst [smem:[#allocation13_spill]] %s2189_s11  ;;  %s1946_s25 = smov 0  }
   0x4   :  { %2202 = sst [smem:[#allocation14_spill]] %s2190_s12 }
   0x5   :  { %2203 = sst [smem:[#allocation15_spill]] %s2191_s13 }
   0x6 LB: > { %2204 = sst [smem:[#allocation6_spill]] %s1837_s23  ;;  %s36_s26 = sadd.s32 1, %s1837_s23  ;;  %s1845_s25 = sphi %s1946_s25, %s27_s25   ;;  %s1841_s24 = sphi %s1944_s24, %s2218_s24   ;;  %s1837_s23 = sphi %s1942_s23, %s2217_s23   ;;  %s1833_s22 = sphi %s1940_s22, %s2216_s22   ;;  %s1829_s21 = sphi %s1938_s21, %s2215_s21  }
   0x7   : > { %2205 = sst [smem:[#allocation7_spill]] %s1841_s24  ;;  %s39_s27 = sadd.s32 1, %s1841_s24 }
   0x8   : > { %2206 = sst [smem:[#allocation8_spill]] %s1845_s25  ;;  %p37_p0 = scmp.ge.s32.totalorder %s36_s26, 2 }
   0x9   : > { %p1588_p1 = scmp.ge.s32.totalorder %s1845_s25, 1  ;;  %p502_p2 = scmp.lt.s32.totalorder %s1845_s25, 5 }
   0xa   : > { %s2220_s26 = smov (%p37_p0, %s36_s26), 0  ;;  %s2222_s27 = smov (!%p37_p0, %s39_s27), %s1841_s24 }
   0xb   : > { %2207 = sst [smem:[#allocation9_spill]] %s2220_s26  ;;  %p503_p3 = pnand %p1588_p1, %p502_p2 }
   0xc   : > { %p41_p4 = scmp.ge.s32.totalorder %s2222_s27, 2  ;;  %s1589_s28 = sshll.u32 (!%p503_p3), %s1833_s22, 3 }
   0xd   : > { %506 = sbr.rel (%p503_p3) target bundleno = 2095 (0x82f), region = 80  ;;  %s1595_s29 = sshll.u32 (!%p503_p3), %s1829_s21, 5 }
   0xe   : > { %s2224_s27 = smov (%p41_p4, %s2222_s27), 0  ;;  %p568_p5 = scmp.lt.s32.totalorder (!%p503_p3), %s1589_s28, 15 }
   0xf   : > { %2208 = sst [smem:[#allocation10_spill]] %s2224_s27  ;;  %p582_p6 = scmp.lt.s32.totalorder (!%p503_p3), %s1595_s29, 63 }
  0x10   : > { %p587_p7 = scmp.lt.s32.totalorder (!%p503_p3), %s1833_s22, 1  ;;  %s2209_s18 = sld [smem:[#allocation11_spill]] (!%p503_p3) }
  0x11   : > { %p1599_p8 = scmp.ne.s32.totalorder (!%p503_p3), %s1829_s21, 0 }
  0x12   : > { %s2226_s28 = smov (!%p568_p5, %s1589_s28), 15  ;;  %s2228_s29 = smov (!%p582_p6, %s1595_s29), 63 }
  0x13   : > { %s1640_s30 = sshll.u32 %s2226_s28, 4  ;;  %s1596_s27 = sshll.u32 %s2228_s29, 2 }
  0x14   : > { %s1979_s24 = scalar_lea.vmem %s2179_s1, %s1640_s30  ;;  %s1984_s13 = scalar_lea.vmem %s2192_s14, %s1596_s27 }
  0x15   : > { %s2230_s22 = smov (!%p587_p7, %s1833_s22), 1  ;;  %599 = sbr.rel (%p1599_p8) target bundleno = 1288 (0x508), region = 84 }
  0x16   : > { %s1974_s19 = scalar_lea.vmem %s2209_s18, %s1640_s30  ;;  %s1597_s11 = sshll.u32 %s2230_s22, 3 }
  0x17   : > { %s1989_s12 = scalar_lea.vmem %s2193_s15, %s1597_s11  ;;  %s1994_s18 = scalar_lea.vmem %s2194_s16, %s1597_s11 }
  0x18   : > { %s2210_s30 = sld [smem:[#allocation14_spill]] (!%p1599_p8) }
  0x19   : > { %s2211_s17 = sld [smem:[#allocation12_spill]] (!%p1599_p8) }
  0x1a   : > { %v600_v0 = vld [vmem:[%s1974_s19] sm:$0xff]  ;;  %v601_v1 = vld [vmem:[%s1974_s19 + $0x8] sm:$0xff]  ;;  %v602_v5 = vld [vmem:[%s1974_s19 + $0x10] sm:$0xff]  ;;  %vm733_vm0 = vcmask 1043456   ;;  %v1847_v25 = vmov 0.0   ;;  %vm1848_vm1 = vmmov 0   ;;  %v680_v52 = vlaneseq }
  0x1b   : > { %v604_v2 = vld [vmem:[%s1974_s19 + $0x20] sm:$0xff]  ;;  %v616_v3 = vadd.f32 %v601_v1, %v600_v0  ;;  %v605_v4 = vld [vmem:[%s1974_s19 + $0x28] sm:$0xff]  ;;  %v603_v6 = vld [vmem:[%s1974_s19 + $0x18] sm:$0xff]  ;;  %1676 = vmatprep.subr.bf16.mxu0 %v1847_v25  ;;  %1682 = vmatprep.subr.bf16.mxu1 %v1847_v25  ;;  %vm714_vm2 = vcmask 1041409   ;;  %vm716_vm3 = vcmask 1042434   ;;  %vm718_vm4 = vcmask 1043459  }
  0x1c   : > { %v622_v7 = vadd.f32 %v605_v4, %v604_v2  ;;  %v606_v8 = vld [vmem:[%s1974_s19 + $0x30] sm:$0xff]  ;;  %v607_v9 = vld [vmem:[%s1974_s19 + $0x38] sm:$0xff]  ;;  %v619_v10 = vadd.f32 %v603_v6, %v602_v5  ;;  %v608_v12 = vld [vmem:[%s1974_s19 + $0x40] sm:$0xff]  ;;  %1678 = vmatprep.mubr.msk.bf16.mxu0 %vm1848_vm1, %v1847_v25  ;;  %1686 = vmatprep.mubr.msk.bf16.mxu1 %vm1848_vm1, %v1847_v25  ;;  %v681_v57 = vand.u32 127, %v680_v52  ;;  %v683_v58 = vshrl.u32 %v680_v52, 7  ;;  %s2212_s22 = sld [smem:[#allocation13_spill]] }
  0x1d   : > { %617 = vadd.xlane.f32.xlu0 %v616_v3  ;;  %v625_v11 = vadd.f32 %v607_v9, %v606_v8  ;;  %v609_v13 = vld [vmem:[%s1974_s19 + $0x48] sm:$0xff]  ;;  %v610_v14 = vld [vmem:[%s1974_s19 + $0x50] sm:$0xff]  ;;  %v611_v15 = vld [vmem:[%s1974_s19 + $0x58] sm:$0xff]  ;;  %vm720_vm5 = vcmask 1044484   ;;  %vm722_vm6 = vcmask 1045509   ;;  %vm724_vm7 = vcmask 1046534  }
  0x1e   : > { %623 = vadd.xlane.f32.xlu1 %v622_v7  ;;  %v612_v16 = vld [vmem:[%s1974_s19 + $0x60] sm:$0xff]  ;;  %v613_v17 = vld [vmem:[%s1974_s19 + $0x68] sm:$0xff]  ;;  %v628_v18 = vadd.f32 %v609_v13, %v608_v12  ;;  %v614_v19 = vld [vmem:[%s1974_s19 + $0x70] sm:$0xff]  ;;  %v631_v21 = vadd.f32 %v611_v15, %v610_v14  ;;  %v2044_v1 = vsub.s32 %v681_v57, %v683_v58  ;;  %vm726_vm8 = vcmask 1047559   ;;  %s2213_s25 = sld [smem:[#allocation15_spill]] }
  0x1f   : > { %v615_v20 = vld [vmem:[%s1974_s19 + $0x78] sm:$0xff]  ;;  %v634_v22 = vadd.f32 %v613_v17, %v612_v16  ;;  %v656_v24 = vld [vmem:[%s2180_s2] sm:$0xf]  ;;  %v920_v28 = vld [vmem:[%s1979_s24 + $0x8] sm:$0xff]  ;;  %vm729_vm9 = vcmask 64512   ;;  %vm801_vm10 = vcmask 261120  }
  0x20   : > { %v637_v23 = vadd.f32 %v615_v20, %v614_v19  ;;  %v735_v26 = vsel %vm733_vm0, %v656_v24, 0  ;;  %v919_v27 = vld [vmem:[%s1979_s24] sm:$0xff]  ;;  %v921_v29 = vld [vmem:[%s1979_s24 + $0x10] sm:$0xff]  ;;  %v922_v31 = vld [vmem:[%s1979_s24 + $0x18] sm:$0xff]  ;;  %vm1232_vm11 = vcmask 7168  }
  0x21   : > { %620 = vadd.xlane.f32.xlu0 %v619_v10  ;;  %1677 = vmatpush3.bf16.msra.mxu0 %v735_v26  ;;  %v935_v30 = vadd.f32 %v920_v28, %v919_v27  ;;  %v923_v32 = vld [vmem:[%s1979_s24 + $0x20] sm:$0xff]  ;;  %v924_v33 = vld [vmem:[%s1979_s24 + $0x28] sm:$0xff]  ;;  %v938_v34 = vadd.f32 %v922_v31, %v921_v29  ;;  %v925_v35 = vld [vmem:[%s1979_s24 + $0x30] sm:$0xff]  ;;  %1235 = vst.msk [vmem:[#allocation5] sm:$0xff] %vm1232_vm11, %v1847_v25 }
  0x22   : > { %626 = vadd.xlane.f32.xlu1 %v625_v11  ;;  %1690 = vmatprep.subr.bf16.mxu0 %v1847_v25  ;;  %v926_v36 = vld [vmem:[%s1979_s24 + $0x38] sm:$0xff]  ;;  %v941_v37 = vadd.f32 %v924_v33, %v923_v32  ;;  %v927_v39 = vld [vmem:[%s1979_s24 + $0x40] sm:$0xff]  ;;  %v928_v40 = vld [vmem:[%s1979_s24 + $0x48] sm:$0xff] }
  0x23   : > { %v944_v38 = vadd.f32 %v926_v36, %v925_v35  ;;  %v929_v41 = vld [vmem:[%s1979_s24 + $0x50] sm:$0xff]  ;;  %v930_v42 = vld [vmem:[%s1979_s24 + $0x58] sm:$0xff]  ;;  %v947_v43 = vadd.f32 %v928_v40, %v927_v39  ;;  %v931_v45 = vld [vmem:[%s1979_s24 + $0x60] sm:$0xff] }
  0x24   : > { %v950_v44 = vadd.f32 %v930_v42, %v929_v41  ;;  %v932_v46 = vld [vmem:[%s1979_s24 + $0x68] sm:$0xff]  ;;  %v933_v47 = vld [vmem:[%s1979_s24 + $0x70] sm:$0xff]  ;;  %v934_v48 = vld [vmem:[%s1979_s24 + $0x78] sm:$0xff] }
  0x25   : > { %629 = vadd.xlane.f32.xlu0 %v628_v18  ;;  %v953_v49 = vadd.f32 %v932_v46, %v931_v45  ;;  %v956_v50 = vadd.f32 %v934_v48, %v933_v47  ;;  %v1766_v51 = vld [vmem:[%s2182_s4 + $0x8] sm:$0xff]  }
  0x26   : > { %632 = vadd.xlane.f32.xlu1 %v631_v21  ;;  %1683 = vmatpush3.bf16.msra.mxu1 %v1766_v51 }
  0x27   : > { %1684 = vmatprep.subr.bf16.mxu1 %v1847_v25 }
  0x29   : > { %635 = vadd.xlane.f32.xlu0 %v634_v22 }
  0x2a   : > { %638 = vadd.xlane.f32.xlu1 %v637_v23 }
  0x2d   : > { %936 = vadd.xlane.f32.xlu0 %v935_v30 }
  0x2e   : > { %939 = vadd.xlane.f32.xlu1 %v938_v34 }
  0x31   : > { %942 = vadd.xlane.f32.xlu0 %v941_v37 }
  0x32   : > { %945 = vadd.xlane.f32.xlu1 %v944_v38 }
  0x35   : > { %948 = vadd.xlane.f32.xlu0 %v947_v43 }
  0x36   : > { %951 = vadd.xlane.f32.xlu1 %v950_v44 }
  0x39   : > { %954 = vadd.xlane.f32.xlu0 %v953_v49 }
  0x3a   : > { %957 = vadd.xlane.f32.xlu1 %v956_v50 }
  0xa6   : > { %v618_v53 = vpop.xlane.xlu0 %617 }
  0xa7   : > { %v640_v54 = vmul.f32 0.00390625, %v618_v53  ;;  %v624_v55 = vpop.xlane.xlu1 %623 }
  0xa8   : > { %v642_v56 = vmul.f32 0.00390625, %v624_v55 }
  0xa9   : > { %v648_v59 = vpack.c.bf16 %v640_v54, %v640_v54 }
  0xaa   : > { %v650_v60 = vpack.c.bf16 %v642_v56, %v642_v56  ;;  %v621_v61 = vpop.xlane.xlu0 %620 }
  0xab   : > { %v641_v62 = vmul.f32 0.00390625, %v621_v61  ;;  %v627_v63 = vpop.xlane.xlu1 %626  ;;  %v672_v2 = vunpack.c.l.b16 %v648_v59 }
  0xac   : > { %v643_v0 = vmul.f32 0.00390625, %v627_v63  ;;  %v674_v4 = vunpack.c.l.b16 %v650_v60 }
  0xad   : > { %v649_v3 = vpack.c.bf16 %v641_v62, %v641_v62  ;;  %v685_v12 = vrot.slane %v672_v2, %v2044_v1 }
  0xae   : > { %v651_v5 = vpack.c.bf16 %v643_v0, %v643_v0  ;;  %v630_v6 = vpop.xlane.xlu0 %629  ;;  %v693_v15 = vrot.slane %v674_v4, %v2044_v1 }
  0xaf   : > { %v673_v7 = vunpack.c.l.b16 %v649_v3  ;;  %v644_v8 = vmul.f32 0.00390625, %v630_v6  ;;  %v633_v9 = vpop.xlane.xlu1 %632 }
  0xb0   : > { %v675_v10 = vunpack.c.l.b16 %v651_v5  ;;  %v645_v11 = vmul.f32 0.00390625, %v633_v9 }
  0xb1   : > { %v689_v13 = vrot.slane %v673_v7, %v2044_v1  ;;  %v652_v14 = vpack.c.bf16 %v644_v8, %v644_v8 }
  0xb2   : > { %v697_v16 = vrot.slane %v675_v10, %v2044_v1  ;;  %v653_v17 = vpack.c.bf16 %v645_v11, %v645_v11  ;;  %v636_v18 = vpop.xlane.xlu0 %635 }
  0xb3   : > { %v715_v19 = vsel %vm714_vm2, %v689_v13, %v685_v12  ;;  %v676_v20 = vunpack.c.l.b16 %v652_v14  ;;  %v646_v21 = vmul.f32 0.00390625, %v636_v18  ;;  %v639_v22 = vpop.xlane.xlu1 %638 }
  0xb4   : > { %v717_v23 = vsel %vm716_vm3, %v693_v15, %v715_v19  ;;  %v677_v24 = vunpack.c.l.b16 %v653_v17  ;;  %v647_v26 = vmul.f32 0.00390625, %v639_v22 }
  0xb5   : > { %v719_v27 = vsel %vm718_vm4, %v697_v16, %v717_v23  ;;  %v701_v28 = vrot.slane %v676_v20, %v2044_v1  ;;  %v654_v29 = vpack.c.bf16 %v646_v21, %v646_v21 }
  0xb6   : > { %v705_v30 = vrot.slane %v677_v24, %v2044_v1  ;;  %v655_v31 = vpack.c.bf16 %v647_v26, %v647_v26  ;;  %v937_v41 = vpop.xlane.xlu0 %936  ;;  %v1767_v26 = vld [vmem:[%s2182_s4] sm:$0xff]  }
  0xb7   : > { %v721_v32 = vsel %vm720_vm5, %v701_v28, %v719_v27  ;;  %v678_v33 = vunpack.c.l.b16 %v654_v29  ;;  %v959_v42 = vmul.f32 0.00390625, %v937_v41  ;;  %v940_v43 = vpop.xlane.xlu1 %939  ;;  %1685 = vmatpush3.bf16.msra.mxu1 %v1767_v26  ;;  %v1768_v27 = vld [vmem:[%s2184_s6 + $0x8] sm:$0xff]   ;;  %v975_v28 = vld [vmem:[%s2186_s8] sm:$0xf] }
  0xb8   : > { %v679_v34 = vunpack.c.l.b16 %v655_v31  ;;  %v723_v36 = vsel %vm722_vm6, %v705_v30, %v721_v32  ;;  %v960_v44 = vmul.f32 0.00390625, %v940_v43  ;;  %1698 = vmatprep.subr.bf16.mxu1 %v1847_v25  ;;  %v1043_v32 = vsel %vm733_vm0, %v975_v28, 0 }
  0xb9   : > { %v709_v35 = vrot.slane %v678_v33, %v2044_v1  ;;  %v967_v45 = vpack.c.bf16 %v959_v42, %v959_v42 }
  0xba   : > { %v713_v37 = vrot.slane %v679_v34, %v2044_v1  ;;  %v968_v46 = vpack.c.bf16 %v960_v44, %v960_v44  ;;  %v943_v47 = vpop.xlane.xlu0 %942  ;;  %v1770_v44 = vld [vmem:[%s2188_s10 + $0x8] sm:$0xff]  }
  0xbb   : > { %v725_v38 = vsel %vm724_vm7, %v709_v35, %v723_v36  ;;  %v991_v48 = vunpack.c.l.b16 %v967_v45  ;;  %v961_v49 = vmul.f32 0.00390625, %v943_v47  ;;  %v946_v50 = vpop.xlane.xlu1 %945  ;;  %v1610_v47 = vld [vmem:[%s2187_s9] ss:$0 sm:$0xff] }
  0xbc   : > { %v727_v39 = vsel %vm726_vm8, %v713_v37, %v725_v38  ;;  %v992_v51 = vunpack.c.l.b16 %v968_v46  ;;  %v962_v52 = vmul.f32 0.00390625, %v946_v50  ;;  %v1769_v37 = vld [vmem:[%s2184_s6] sm:$0xff]  }
  0xbd   : > { %v728_v40 = vpack.c.b16 %v727_v39, %v727_v39  ;;  %v1002_v53 = vrot.slane %v991_v48, %v2044_v1  ;;  %v969_v54 = vpack.c.bf16 %v961_v49, %v961_v49  ;;  %v1602_v38 = vld [vmem:[%s2183_s5] ss:$0 sm:$0xff] }
  0xbe   : > { %v1006_v55 = vrot.slane %v992_v51, %v2044_v1  ;;  %v970_v56 = vpack.c.bf16 %v962_v52, %v962_v52  ;;  %v949_v57 = vpop.xlane.xlu0 %948  ;;  %v1771_v49 = vld [vmem:[%s2188_s10] sm:$0xff]  }
  0xbf   : > { %1679 = vmatmul.mubr.msk.bf16.vlgmr.msra.gmra.mxu0 %vm729_vm9, %v728_v40  ;;  %v993_v58 = vunpack.c.l.b16 %v969_v54  ;;  %v963_v59 = vmul.f32 0.00390625, %v949_v57  ;;  %v952_v60 = vpop.xlane.xlu1 %951  ;;  %v1606_v57 = vld [vmem:[%s2211_s17] ss:$0 sm:$0xff] }
  0xc0   : > { %1694 = vmatprep.mubr.msk.bf16.mxu0 %vm1848_vm1, %v1847_v25  ;;  %v1031_v61 = vsel %vm714_vm2, %v1006_v55, %v1002_v53  ;;  %v994_v62 = vunpack.c.l.b16 %v970_v56  ;;  %v964_v63 = vmul.f32 0.00390625, %v952_v60  ;;  %1691 = vmatpush3.bf16.msra.mxu0 %v1768_v27  ;;  %v1772_v55 = vld [vmem:[%s2210_s30 + $0x8] sm:$0xff]   ;;  %v1773_v56 = vld [vmem:[%s2210_s30] sm:$0xff]  }
  0xc1   : > { %v1010_v0 = vrot.slane %v993_v58, %v2044_v1  ;;  %v971_v2 = vpack.c.bf16 %v963_v59, %v963_v59  ;;  %1692 = vmatprep.subr.bf16.mxu0 %v1847_v25 }
  0xc2   : > { %v1014_v3 = vrot.slane %v994_v62, %v2044_v1  ;;  %v972_v4 = vpack.c.bf16 %v964_v63, %v964_v63  ;;  %v955_v5 = vpop.xlane.xlu0 %954 }
  0xc3   : > { %v1032_v6 = vsel %vm716_vm3, %v1010_v0, %v1031_v61  ;;  %v995_v7 = vunpack.c.l.b16 %v971_v2  ;;  %v965_v8 = vmul.f32 0.00390625, %v955_v5  ;;  %v958_v9 = vpop.xlane.xlu1 %957  ;;  %v1612_v0 = vld [vmem:[%s2212_s22] ss:$0 sm:$0xff] }
  0xc4   : > { %v1033_v10 = vsel %vm718_vm4, %v1014_v3, %v1032_v6  ;;  %v996_v11 = vunpack.c.l.b16 %v972_v4  ;;  %v966_v12 = vmul.f32 0.00390625, %v958_v9  ;;  %1693 = vmatpush3.bf16.msra.mxu0 %v1769_v37 }
  0xc5   : > { %v1018_v13 = vrot.slane %v995_v7, %v2044_v1  ;;  %v973_v14 = vpack.c.bf16 %v965_v8, %v965_v8  ;;  %1704 = vmatprep.subr.bf16.mxu0 %v1847_v25 }
  0xc6   : > { %v1022_v15 = vrot.slane %v996_v11, %v2044_v1  ;;  %v974_v16 = vpack.c.bf16 %v966_v12, %v966_v12 }
  0xc7   : > { %v1034_v17 = vsel %vm720_vm5, %v1018_v13, %v1033_v10  ;;  %v997_v18 = vunpack.c.l.b16 %v973_v14  ;;  %v1616_v14 = vld [vmem:[%s2213_s25] ss:$0 sm:$0xff] }
  0xc8   : > { %v1035_v19 = vsel %vm722_vm6, %v1022_v15, %v1034_v17  ;;  %v998_v20 = vunpack.c.l.b16 %v974_v16 }
  0xc9   : > { %v1026_v21 = vrot.slane %v997_v18, %v2044_v1 }
  0xca   : > { %v1030_v22 = vrot.slane %v998_v20, %v2044_v1  ;;  %v1600_v1 = vld [vmem:[%s2181_s3] ss:$0 sm:$0xff] }
  0xcb   : > { %v1036_v23 = vsel %vm724_vm7, %v1026_v21, %v1035_v19  ;;  %v1849_v21 = vmov -inf  }
  0xcc   : > { %v1037_v24 = vsel %vm726_vm8, %v1030_v22, %v1036_v23  ;;  %1234 = vst.msk [vmem:[#allocation4] sm:$0xff] %vm1232_vm11, %v1849_v21 }
  0xcd   : > { %v1038_v36 = vpack.c.b16 %v1037_v24, %v1037_v24 }
 0x17f   : > { %v771_v29 = vpop.f32.mrf.mxu0 }
 0x180   : > { %v772_v30 = vadd.f32 %v1600_v1, %v771_v29 }
 0x181   : > { %v1680_v31 = vpop.f32.mrf.mxu0 }
 0x182   : > { %v777_v33 = vpack.c.bf16 %v772_v30, %v772_v30 }
 0x183   : > { %v774_v34 = vpop.f32.mrf.mxu0 }
 0x184   : > { %1687 = vmatmul.mubr.msk.bf16.vlgmr.msra.gmra.mxu1 %vm801_vm10, %v777_v33 }
 0x185   : > { %v1681_v35 = vpop.f32.mrf.mxu0  ;;  %1699 = vmatpush3.bf16.msra.mxu1 %v1043_v32  ;;  %1700 = vmatprep.mubr.msk.bf16.mxu1 %vm1848_vm1, %v1847_v25 }
 0x186   : > { %1712 = vmatprep.subr.bf16.mxu1 %v1847_v25 }
 0x18c   : > { %1701 = vmatmul.mubr.msk.bf16.vlgmr.msra.gmra.mxu1 %vm729_vm9, %v1038_v36 }
 0x18d   : > { %1716 = vmatprep.mubr.msk.bf16.mxu1 %vm1848_vm1, %v1847_v25  ;;  %1713 = vmatpush3.bf16.msra.mxu1 %v1772_v55 }
 0x18e   : > { %1714 = vmatprep.subr.bf16.mxu1 %v1847_v25 }
 0x191   : > { %1715 = vmatpush3.bf16.msra.mxu1 %v1773_v56 }
 0x244   : > { %v839_v39 = vpop.f32.mrf.mxu1 }
 0x245   : > { %v840_v40 = vadd.f32 %v1602_v38, %v839_v39 }
 0x246   : > { %v1688_v41 = vpop.f32.mrf.mxu1 }
 0x247   : > { %v845_v42 = vmax.f32 %v840_v40, 0.0 }
 0x248   : > { %v842_v43 = vpop.f32.mrf.mxu1 }
 0x249   : > { %v846_v45 = vpack.c.bf16 %v845_v42, %v845_v42 }
 0x24a   : > { %v1689_v46 = vpop.f32.mrf.mxu1 }
 0x24b   : > { %1695 = vmatmul.mubr.msk.bf16.vlgmr.msra.gmra.mxu0 %vm801_vm10, %v846_v45 }
 0x24c   : > { %1705 = vmatpush3.bf16.msra.mxu0 %v1770_v44  ;;  %v1079_v48 = vpop.f32.mrf.mxu1  ;;  %1708 = vmatprep.mubr.msk.bf16.mxu0 %vm1848_vm1, %v1847_v25 }
 0x24d   : > { %v1080_v50 = vadd.f32 %v1610_v47, %v1079_v48  ;;  %1706 = vmatprep.subr.bf16.mxu0 %v1847_v25 }
 0x24e   : > { %v1702_v51 = vpop.f32.mrf.mxu1 }
 0x24f   : > { %v1085_v53 = vpack.c.bf16 %v1080_v50, %v1080_v50 }
 0x250   : > { %1707 = vmatpush3.bf16.msra.mxu0 %v1771_v49  ;;  %v1082_v52 = vpop.f32.mrf.mxu1 }
 0x252   : > { %v1703_v54 = vpop.f32.mrf.mxu1 }
 0x253   : > { %1709 = vmatmul.mubr.msk.bf16.vlgmr.msra.gmra.mxu0 %vm801_vm10, %v1085_v53 }
 0x30b   : > { %v907_v58 = vpop.f32.mrf.mxu0 }
 0x30c   : > { %v908_v59 = vadd.f32 %v1606_v57, %v907_v58 }
 0x30d   : > { %v1696_v60 = vpop.f32.mrf.mxu0 }
 0x30e   : > { %v913_v61 = vmul.f32 %v908_v59, %v908_v59 }
 0x30f   : > { %v910_v62 = vpop.f32.mrf.mxu0 }
 0x310   : > { %914 = vadd.xlane.f32.xlu0 %v913_v61 }
 0x311   : > { %v1697_v63 = vpop.f32.mrf.mxu0 }
 0x313   : > { %v1146_v2 = vpop.f32.mrf.mxu0 }
 0x314   : > { %v1147_v3 = vadd.f32 %v1612_v0, %v1146_v2 }
 0x315   : > { %v1710_v4 = vpop.f32.mrf.mxu0 }
 0x316   : > { %v1152_v5 = vmax.f32 %v1147_v3, 0.0 }
 0x317   : > { %v1149_v6 = vpop.f32.mrf.mxu0 }
 0x318   : > { %v1153_v7 = vpack.c.bf16 %v1152_v5, %v1152_v5 }
 0x319   : > { %v1711_v8 = vpop.f32.mrf.mxu0 }
 0x31a   : > { %1717 = vmatmul.mubr.msk.bf16.vlgmr.msra.gmra.mxu1 %vm801_vm10, %v1153_v7 }
 0x399   : > { %v915_v9 = vpop.xlane.xlu0 %914 }
 0x39a   : > { %v916_v10 = vmax.f32 %v915_v9, 1e-24 }
 0x39c   : > { %1774 = vrsqrt.f32 %v916_v10 }
 0x3a9   : > { %v1775_v11 = vpop.eup %1774 }
 0x3aa   : > { %v918_v12 = vmul.f32 %v1775_v11, %v908_v59 }
 0x3ac   : > { %v1226_v13 = vmul.f32 5.0, %v918_v12 }
 0x3ae   : > { %1227 = vst [vmem:[#allocation2] sm:$0xff] %v1226_v13 }
 0x3da   : > { %v1214_v15 = vpop.f32.mrf.mxu1 }
 0x3db   : > { %v1215_v16 = vadd.f32 %v1616_v14, %v1214_v15 }
 0x3dc   : > { %v1718_v17 = vpop.f32.mrf.mxu1 }
 0x3dd   : > { %v1220_v18 = vmul.f32 %v1215_v16, %v1215_v16 }
 0x3de   : > { %v1217_v19 = vpop.f32.mrf.mxu1 }
 0x3df   : > { %1221 = vadd.xlane.f32.xlu1 %v1220_v18 }
 0x3e0   : > { %v1719_v20 = vpop.f32.mrf.mxu1 }
 0x468   : > { %v1222_v22 = vpop.xlane.xlu1 %1221 }
 0x469   : > { %v1223_v23 = vmax.f32 %v1222_v22, 1e-24 }
 0x46b   : > { %1776 = vrsqrt.f32 %v1223_v23 }
 0x478   : > { %v1777_v24 = vpop.eup %1776 }
 0x479   : > { %v1225_v26 = vmul.f32 %v1777_v24, %v1215_v16 }
 0x47b   : > { %1228 = vst [vmem:[%s1994_s18] sm:$0xff] %v1225_v26  ;;  %v1229_v27 = vmul.f32 %v1226_v13, %v1225_v26 }
 0x47d   : > { %1230 = vadd.xlane.f32.xlu0 %v1229_v27 }
 0x506   : > { %v1231_v1 = vpop.xlane.xlu0 %1230 }
 0x507   : > { %1233 = vst.msk [vmem:[#allocation3] sm:$0xff] %vm1232_vm11, %v1231_v1 }
 0x508 PF: > { %v1779_v28 = vld [vmem:[%s1984_s13 + $0x78] sm:$0xff]   ;;  %v1781_v29 = vld [vmem:[%s1984_s13 + $0x70] sm:$0xff]   ;;  %v1783_v31 = vld [vmem:[%s1984_s13 + $0x68] sm:$0xff]   ;;  %v1850_v50 = vmov 0   ;;  %vm1432_vm12 = vcmask 7168   ;;  %p1636_p9 = scmp.ne.s32.totalorder %s1829_s21, 1 }
 0x509   : > { %v1780_v25 = vld [vmem:[%s1984_s13 + $0x38] sm:$0xff]   ;;  %1658 = vmatprep.subr.bf16.mxu0 %v1779_v28  ;;  %v1782_v30 = vld [vmem:[%s1984_s13 + $0x30] sm:$0xff]   ;;  %v1784_v32 = vld [vmem:[%s1984_s13 + $0x28] sm:$0xff]   ;;  %1778 = vset.pattern.permute.xlu0 %v1850_v50 }
 0x50a   : > { %1659 = vmatpush3.bf16.xpose.msra.mxu0 %v1780_v25  ;;  %v1785_v33 = vld [vmem:[%s1984_s13 + $0x60] sm:$0xff]   ;;  %v1787_v37 = vld [vmem:[%s1984_s13 + $0x58] sm:$0xff]   ;;  %v1789_v39 = vld [vmem:[%s1984_s13 + $0x50] sm:$0xff]  }
 0x50b   : > { %1660 = vmatprep.subr.bf16.mxu0 %v1781_v29  ;;  %v1236_v34 = vld [vmem:[#allocation2] sm:$0xff]  ;;  %v1788_v38 = vld [vmem:[%s1984_s13 + $0x18] sm:$0xff]   ;;  %v1790_v40 = vld [vmem:[%s1984_s13 + $0x10] sm:$0xff]  }
 0x50c   : > { %v1237_v35 = vpack.c.bf16 %v1236_v34, %v1236_v34  ;;  %v1786_v36 = vld [vmem:[%s1984_s13 + $0x20] sm:$0xff]   ;;  %v1791_v41 = vld [vmem:[%s1984_s13 + $0x48] sm:$0xff]   ;;  %v1410_v51 = vld [vmem:[#allocation4] sm:$0xff] }
 0x50d   : > { %v1792_v42 = vld [vmem:[%s1984_s13 + $0x8] sm:$0xff]   ;;  %v1793_v43 = vld [vmem:[%s1984_s13 + $0x40] sm:$0xff]   ;;  %v1412_v2 = vld [vmem:[#allocation5] sm:$0xff] }
 0x50e   : > { %1674 = vmatprep.mubr.bf16.mxu0 %v1237_v35  ;;  %v1794_v44 = vld [vmem:[%s1984_s13] sm:$0xff]   ;;  %s1852_s13 = smov (!%p1636_p9), 1  }
 0x512   : > { %1661 = vmatpush3.bf16.xpose.msra.mxu0 %v1782_v30 }
 0x513   : > { %1662 = vmatprep.subr.bf16.mxu0 %v1783_v31 }
 0x51a   : > { %1663 = vmatpush3.bf16.xpose.msra.mxu0 %v1784_v32 }
 0x51b   : > { %1664 = vmatprep.subr.bf16.mxu0 %v1785_v33 }
 0x522   : > { %1665 = vmatpush3.bf16.xpose.msra.mxu0 %v1786_v36 }
 0x523   : > { %1666 = vmatprep.subr.bf16.mxu0 %v1787_v37 }
 0x52a   : > { %1667 = vmatpush3.bf16.xpose.msra.mxu0 %v1788_v38 }
 0x52b   : > { %1668 = vmatprep.subr.bf16.mxu0 %v1789_v39 }
 0x532   : > { %1669 = vmatpush3.bf16.xpose.msra.mxu0 %v1790_v40 }
 0x533   : > { %1670 = vmatprep.subr.bf16.mxu0 %v1791_v41 }
 0x53a   : > { %1671 = vmatpush3.bf16.xpose.msra.mxu0 %v1792_v42 }
 0x53b   : > { %1672 = vmatprep.subr.bf16.mxu0 %v1793_v43 }
 0x542   : > { %1673 = vmatpush3.bf16.xpose.msra.mxu0 %v1794_v44 }
 0x549   : > { %1675 = vmatmul.mubr.bf16.vlgmr.msra.gmra.mxu0 %v1237_v35 }
 0x609   : > { %v1400_v45 = vpop.f32.mrf.mxu0 }
 0x60b   : > { %v1402_v46 = vpop.f32.mrf.mxu0 }
 0x60c   : > { %v1407_v47 = vmax.f32 %v1400_v45, %v1402_v46 }
 0x60d   : > { %v1404_v48 = vpop.f32.mrf.mxu0 }
 0x60e   : > { %1408 = vmax.xlane.f32.xlu0 %v1407_v47 }
 0x60f   : > { %v1405_v49 = vpop.f32.mrf.mxu0 }
 0x697   : > { %v1409_v52 = vpop.xlane.xlu0 %1408 }
 0x698   : > { %v1411_v53 = vmax.f32 %v1410_v51, %v1409_v52 }
 0x69a   : > { %v1413_v54 = vsub.f32 %v1410_v51, %v1411_v53  ;;  %1434 = vst.msk [vmem:[#allocation4] sm:$0xff] %vm1432_vm12, %v1411_v53  ;;  %1419 = vperm.xlu0 %1778, %v1411_v53  }
 0x69c   : > { %v1414_v63 = vmul.f32 1.442695, %v1413_v54 }
 0x715   : > { %v1420_v55 = vpop.permute.xlu0 %1419 }
 0x716   : > { %v1422_v56 = vsub.f32 %v1400_v45, %v1420_v55  ;;  %v1423_v57 = vsub.f32 %v1402_v46, %v1420_v55 }
 0x718   : > { %v1424_v58 = vmul.f32 1.442695, %v1422_v56  ;;  %v1426_v59 = vmul.f32 1.442695, %v1423_v57 }
 0x71a   : > { %1795 = vpow2.f32 %v1424_v58 }
 0x71b   : > { %1797 = vpow2.f32 %v1426_v59 }
 0x71c   : > { %1799 = vpow2.f32 %v1414_v63 }
 0x727   : > { %v1796_v60 = vpop.eup %1795 }
 0x728   : > { %v1798_v61 = vpop.eup %1797 }
 0x729   : > { %v1428_v62 = vadd.f32 %v1798_v61, %v1796_v60  ;;  %v1800_v0 = vpop.eup %1799 }
 0x72a   : > { %v1416_v3 = vmul.f32 %v1800_v0, %v1412_v2 }
 0x72b   : > { %1429 = vadd.xlane.f32.xlu1 %v1428_v62 }
 0x7b3   : > { %1438 = sbr.rel (%p1636_p9) target bundleno = 2095 (0x82f), region = 88 }
 0x7b4   : > { %v1430_v4 = vpop.xlane.xlu1 %1429 }
 0x7b5   : > { %v1431_v5 = vadd.f32 %v1430_v4, %v1416_v3 }
 0x7b7   : > { %1433 = vst.msk [vmem:[#allocation5] sm:$0xff] %vm1432_vm12, %v1431_v5 }
 0x7b8   : > { %v1439_v6 = vld [vmem:[#allocation3] sm:$0xff]  ;;  %v1440_v7 = vld [vmem:[#allocation4] sm:$0xff]  ;;  %v1851_v9 = vmov 0.0   ;;  %vm1463_vm14 = vcmask 15368  }
 0x7b9   : > { %v1441_v8 = vmax.f32 %v1440_v7, %v1439_v6  ;;  %vm1456_vm13 = vcmp.ge.f32.partialorder %v1439_v6, %v1440_v7 }
 0x7ba   : > { %v1637_v10 = vsel %vm1456_vm13, 1.0, %v1851_v9 }
 0x7bb   : > { %v1443_v11 = vsub.f32 %v1440_v7, %v1441_v8  ;;  %v1447_v12 = vsub.f32 %v1439_v6, %v1441_v8  ;;  %1460 = vrot.lane.b32.xlu0 %v1637_v10, %s1852_s13 }
 0x7bd   : > { %v1444_v13 = vmul.f32 1.442695, %v1443_v11  ;;  %v1448_v14 = vmul.f32 1.442695, %v1447_v12 }
 0x7be   : > { %v1442_v15 = vld [vmem:[#allocation5] sm:$0xff] }
 0x7bf   : > { %1801 = vpow2.f32 %v1444_v13 }
 0x7c0   : > { %1803 = vpow2.f32 %v1448_v14 }
 0x7cc   : > { %v1802_v16 = vpop.eup %1801 }
 0x7cd   : > { %v1804_v17 = vpop.eup %1803  ;;  %v1446_v18 = vmul.f32 %v1802_v16, %v1442_v15 }
 0x7cf   : > { %v1450_v19 = vadd.f32 %v1804_v17, %v1446_v18 }
 0x7d1   : > { %1805 = vlog2.f32 %v1450_v19 }
 0x7de   : > { %v1806_v20 = vpop.eup %1805 }
 0x7df   : > { %v1452_v21 = vmul.f32 0.6931472, %v1806_v20 }
 0x7e1   : > { %v1453_v22 = vadd.f32 %v1452_v21, %v1441_v8 }
 0x7e3   : > { %v1454_v23 = vsub.f32 %v1453_v22, %v1439_v6 }
 0x7e5   : > { %1455 = vst.msk [vmem:[%s1989_s12] sm:$0xff] %vm1432_vm12, %v1454_v23 }
 0x82d   : > { %v1461_v24 = vpop.permute.xlu0 %1460 }
 0x82e   : > { %1464 = vst.msk [vmem:[%s1989_s12] sm:$0xff] %vm1463_vm14, %v1461_v24 }
 0x82f PF: > { %s2214_s21 = sld [smem:[#allocation8_spill]] }
 0x830   : > { %s2216_s22 = sld [smem:[#allocation7_spill]] }
 0x831   : > { %s2217_s23 = sld [smem:[#allocation9_spill]] }
 0x832   : > { %s2218_s24 = sld [smem:[#allocation10_spill]] }
 0x835   : > { %s27_s25 = sadd.s32 1, %s2214_s21   ;;  %s2215_s21 = sld [smem:[#allocation6_spill]] }
 0x836   : > { %p24_p10 = scmp.ge.s32.totalorder %s27_s25, 6  }
 0x838   :  { %26 = sbr.rel (!%p24_p10) target bundleno = 6 (0x6), region = 136 }

</bundles_post_ra>
